<compile_context>
chip_gen: v7x
topology: tpu7x:2x2x1
jax: 0.10.0
libtpu: 0.0.40
codegen_flags: <defaults>
</compile_context>

<pallas_src>
import functools
import math

import jax
import jax.numpy as jnp
from jax import lax
from jax.experimental import pallas as pl
from jax.experimental.pallas import tpu as pltpu


# ----------------------------------------------------------------------------
# Small helpers
# ----------------------------------------------------------------------------
def _round_up(x, m):
    return ((x + m - 1) // m) * m


def _pick_tile(dim, target, align):
    """Largest `align`-multiple divisor of `dim` <= target, else the full dim."""
    if dim <= target:
        return dim
    t = (target // align) * align
    while t >= align:
        if dim % t == 0:
            return t
        t -= align
    return dim


_VMEM_LIMIT_CACHE = None


def _vmem_limit_bytes():
    """Per-generation scoped-VMEM limit: ~48 MiB on v7x, up to 96 MiB on v5e/v6e."""
    global _VMEM_LIMIT_CACHE
    if _VMEM_LIMIT_CACHE is None:
        try:
            cap = int(pltpu.get_tpu_info().vmem_capacity_bytes)
        except Exception:
            cap = 64 * 1024 * 1024          # conservative fallback (v7x physical)
        _VMEM_LIMIT_CACHE = max(32 * 1024 * 1024,
                                min(3 * cap // 4, 96 * 1024 * 1024))
    return _VMEM_LIMIT_CACHE


# ----------------------------------------------------------------------------
# Tiled linear projection:  y = x @ w_t + b   (weights cast+padded once at init)
# ----------------------------------------------------------------------------
def _linear_kernel(x_ref, w_ref, b_ref, o_ref, acc_ref):
    @pl.when(pl.program_id(2) == 0)
    def _():
        acc_ref[...] = jnp.zeros_like(acc_ref)

    acc_ref[...] += jnp.dot(x_ref[...], w_ref[...],
                            preferred_element_type=jnp.float32)

    @pl.when(pl.program_id(2) == pl.num_programs(2) - 1)
    def _():
        o_ref[...] = (acc_ref[...] + b_ref[...]).astype(o_ref.dtype)


class _PallasLinear:
    """Pre-padded / pre-cast projection.  x: [M, K] -> [M, N]."""

    def __init__(self, w_t, b, compute_dtype, tn=256, tk=512):
        K, N = w_t.shape
        self.K, self.N = K, N
        self.cd = compute_dtype
        # MXU-friendly tiles: 256-aligned (v6e/v7x native 256-wide MXU).
        self.tk = min(tk, _round_up(K, 256))
        self.tn = min(tn, _round_up(N, 256))
        Kp, Np = _round_up(K, self.tk), _round_up(N, self.tn)
        self.Kp, self.Np = Kp, Np
        # Cast + pad ONCE here (not per forward call).
        self.w = jnp.pad(w_t, ((0, Kp - K), (0, Np - N))).astype(compute_dtype)
        self.b = jnp.pad(b, ((0, Np - N),)).astype(jnp.float32).reshape(1, Np)

    def __call__(self, x, out_dtype=None, tm=256):
        M, K = x.shape
        assert K == self.K
        out_dtype = self.cd if out_dtype is None else out_dtype
        itemsize = jnp.dtype(self.cd).itemsize
        sub = 8 if itemsize == 4 else 16            # sublane packing (f32 / bf16)
        tm = min(tm, _round_up(M, sub))
        Mp = _round_up(M, tm)

        xp = x.astype(self.cd)
        if Mp != M or self.Kp != K:
            xp = jnp.pad(xp, ((0, Mp - M), (0, self.Kp - K)))

        tk, tn = self.tk, self.tn
        out = pl.pallas_call(
            _linear_kernel,
            out_shape=jax.ShapeDtypeStruct((Mp, self.Np), out_dtype),
            grid=(Mp // tm, self.Np // tn, self.Kp // tk),
            in_specs=[
                pl.BlockSpec((tm, tk), lambda i, j, k: (i, k)),
                pl.BlockSpec((tk, tn), lambda i, j, k: (k, j)),
                pl.BlockSpec((1, tn), lambda i, j, k: (0, j)),
            ],
            out_specs=pl.BlockSpec((tm, tn), lambda i, j, k: (i, j)),
            scratch_shapes=[pltpu.VMEM((tm, tn), jnp.float32)],
            compiler_params=pltpu.CompilerParams(
                dimension_semantics=("parallel", "parallel", "arbitrary"),
                vmem_limit_bytes=_vmem_limit_bytes(),
            ),
        )(xp, self.w, self.b)
        return out[:M, :self.N]


# ----------------------------------------------------------------------------
# Attention kernels.  q/k/v refs: (1, tile, S, H, hd) slabs ("S" packs the fused
# QKV axis); heads are handled with static in-kernel slices, so no head-split /
# head-merge transposes are ever materialized in HBM.
# ----------------------------------------------------------------------------
def _attn_weights_kernel(*refs, n_heads, has_mask):
    """Full-Lk softmax per q tile; also writes the attention weights."""
    if has_mask:
        q_ref, k_ref, v_ref, mask_ref, o_ref, w_ref = refs
        masked = mask_ref[0] == 0.0                     # (tq, Lk), hoisted
    else:
        q_ref, k_ref, v_ref, o_ref, w_ref = refs
        masked = None

    for h in range(n_heads):                            # static unroll over heads
        q = q_ref[0, :, 0, h, :]                        # (tq, hd); scale folded in
        k = k_ref[0, :, 0, h, :]                        # (Lk, hd)
        v = v_ref[0, :, 0, h, :]                        # (Lk, hd)
        s = lax.dot_general(q, k, (((1,), (1,)), ((), ())),
                            preferred_element_type=jnp.float32)     # (tq, Lk)
        if has_mask:
            s = jnp.where(masked, -1e9, s)              # exact torch masked_fill
        m = jnp.max(s, axis=-1, keepdims=True)
        p = jnp.exp(s - m)
        attn = p / jnp.sum(p, axis=-1, keepdims=True)
        # TODO(synk): dropout on attention weights is eval-mode identity here.
        w_ref[0, h] = attn
        o_ref[0, :, h, :] = lax.dot_general(
            attn.astype(v.dtype), v, (((1,), (0,)), ((), ())),
            preferred_element_type=jnp.float32).astype(o_ref.dtype)


def _flash_attn_kernel(*refs, n_heads, has_mask):
    """No-weights fast path: online softmax over Lk chunks (bounded VMEM)."""
    if has_mask:
        q_ref, k_ref, v_ref, mask_ref, o_ref, m_sc, l_sc, acc_sc = refs
    else:
        q_ref, k_ref, v_ref, o_ref, m_sc, l_sc, acc_sc = refs
        mask_ref = None
    kv = pl.program_id(2)

    @pl.when(kv == 0)
    def _():
        m_sc[...] = jnp.full_like(m_sc, -jnp.inf)
        l_sc[...] = jnp.zeros_like(l_sc)
        acc_sc[...] = jnp.zeros_like(acc_sc)

    masked = mask_ref[0] == 0.0 if has_mask else None   # (tq, tk), hoisted

    for h in range(n_heads):
        q = q_ref[0, :, 0, h, :]                        # (tq, hd)
        k = k_ref[0, :, 0, h, :]                        # (tk, hd)
        v = v_ref[0, :, 0, h, :]                        # (tk, hd)
        s = lax.dot_general(q, k, (((1,), (1,)), ((), ())),
                            preferred_element_type=jnp.float32)     # (tq, tk)
        if has_mask:
            s = jnp.where(masked, -1e9, s)
        m_prev = m_sc[h]                                 # (tq, 1)
        m_new = jnp.maximum(m_prev, jnp.max(s, axis=-1, keepdims=True))
        alpha = jnp.exp(m_prev - m_new)
        p = jnp.exp(s - m_new)
        l_sc[h] = alpha * l_sc[h] + jnp.sum(p, axis=-1, keepdims=True)
        acc_sc[h] = alpha * acc_sc[h] + lax.dot_general(
            p.astype(v.dtype), v, (((1,), (0,)), ((), ())),
            preferred_element_type=jnp.float32)
        m_sc[h] = m_new

    @pl.when(kv == pl.num_programs(2) - 1)
    def _():
        for h in range(n_heads):
            # Exact divide: runs once per q tile, keeps full precision.
            o_ref[0, :, h, :] = (acc_sc[h] / l_sc[h]).astype(o_ref.dtype)


def _weights_path_tq(Lq, Lk, H, hd, itemsize, has_mask, budget, target=256):
    """Pick tq so double-buffered blocks of the need_weights path fit the budget."""
    fixed = 2 * 2 * Lk * H * hd * itemsize              # K + V, double-buffered

    def usage(tq):
        u = fixed
        u += 2 * tq * H * hd * itemsize * 2             # q in + out
        u += 4 * H * tq * Lk * 4                        # weights out (x2) + s/p temps
        if has_mask:
            u += 2 * tq * Lk * 4
        return u

    tq = _pick_tile(Lq, target, 8)
    while tq > 8 and usage(tq) > budget:
        smaller = _pick_tile(Lq, tq - 8, 8)
        if smaller >= tq:
            break
        tq = smaller
    # TODO(synk): for huge Lk*D the full-Lk K/V blocks may still exceed VMEM on
    # v7x; a two-pass (stats then weights) kernel would be needed there.
    return tq


def _attention(q_arr, k_arr, v_arr, sels, *, n_heads, mask=None, need_weights=True):
    """q_arr/k_arr/v_arr: [B, L, S, H, hd] slabs (S = fused-QKV axis, size 1 or 3)."""
    B, Lq = q_arr.shape[0], q_arr.shape[1]
    Lk = k_arr.shape[1]
    H = n_heads
    hd = q_arr.shape[-1]
    q_sel, k_sel, v_sel = sels
    dtype = q_arr.dtype
    itemsize = jnp.dtype(dtype).itemsize
    has_mask = mask is not None
    mask_b = has_mask and mask.shape[0] > 1
    vmem_limit = _vmem_limit_bytes()

    if need_weights:
        tq = _weights_path_tq(Lq, Lk, H, hd, itemsize, has_mask,
                              budget=int(vmem_limit * 0.8))
        grid = (B, Lq // tq)
        in_specs = [
            pl.BlockSpec((1, tq, 1, H, hd), lambda b, qi: (b, qi, q_sel, 0, 0)),
            pl.BlockSpec((1, Lk, 1, H, hd), lambda b, qi: (b, 0, k_sel, 0, 0)),
            pl.BlockSpec((1, Lk, 1, H, hd), lambda b, qi: (b, 0, v_sel, 0, 0)),
        ]
        args = [q_arr, k_arr, v_arr]
        if has_mask:
            in_specs.append(pl.BlockSpec(
                (1, tq, Lk), lambda b, qi: (b if mask_b else 0, qi, 0)))
            args.append(mask)
        kernel = functools.partial(_attn_weights_kernel,
                                   n_heads=H, has_mask=has_mask)
        out, w = pl.pallas_call(
            kernel,
            out_shape=(jax.ShapeDtypeStruct((B, Lq, H, hd), dtype),
                       jax.ShapeDtypeStruct((B, H, Lq, Lk), jnp.float32)),
            grid=grid,
            in_specs=in_specs,
            out_specs=(pl.BlockSpec((1, tq, H, hd), lambda b, qi: (b, qi, 0, 0)),
                       pl.BlockSpec((1, H, tq, Lk), lambda b, qi: (b, 0, qi, 0))),
            compiler_params=pltpu.CompilerParams(
                dimension_semantics=("parallel", "parallel"),
                vmem_limit_bytes=vmem_limit,
            ),
        )(*args)
        return out, w

    # flash-style path (no O(L^2) HBM writeback of the weights)
    tq = _pick_tile(Lq, 128, 8)
    tk = _pick_tile(Lk, 256, 128)
    grid = (B, Lq // tq, Lk // tk)
    # TODO(synk): add pipeline_mode=pl.Buffered(3) on the k/v specs if profiling
    # shows exposed DMA at small head_dim on v5e.
    in_specs = [
        pl.BlockSpec((1, tq, 1, H, hd), lambda b, qi, kv: (b, qi, q_sel, 0, 0)),
        pl.BlockSpec((1, tk, 1, H, hd), lambda b, qi, kv: (b, kv, k_sel, 0, 0)),
        pl.BlockSpec((1, tk, 1, H, hd), lambda b, qi, kv: (b, kv, v_sel, 0, 0)),
    ]
    args = [q_arr, k_arr, v_arr]
    if has_mask:
        in_specs.append(pl.BlockSpec(
            (1, tq, tk), lambda b, qi, kv: (b if mask_b else 0, qi, kv)))
        args.append(mask)
    kernel = functools.partial(_flash_attn_kernel, n_heads=H, has_mask=has_mask)
    out = pl.pallas_call(
        kernel,
        out_shape=jax.ShapeDtypeStruct((B, Lq, H, hd), dtype),
        grid=grid,
        in_specs=in_specs,
        out_specs=pl.BlockSpec((1, tq, H, hd), lambda b, qi, kv: (b, qi, 0, 0)),
        scratch_shapes=[pltpu.VMEM((H, tq, 1), jnp.float32),
                        pltpu.VMEM((H, tq, 1), jnp.float32),
                        pltpu.VMEM((H, tq, hd), jnp.float32)],
        compiler_params=pltpu.CompilerParams(
            dimension_semantics=("parallel", "parallel", "arbitrary"),
            vmem_limit_bytes=vmem_limit,
        ),
    )(*args)
    return out, None


# ----------------------------------------------------------------------------
# Module wrapper (parameters + forward)
# ----------------------------------------------------------------------------
class CustomMultiHeadAttentionPallas:
    def __init__(self, d_model, n_heads, key, dropout=0.1,
                 compute_dtype=jnp.bfloat16):
        assert d_model % n_heads == 0
        self.d_model = d_model
        self.n_heads = n_heads
        self.head_dim = d_model // n_heads
        self.scale = math.sqrt(self.head_dim)
        self.compute_dtype = compute_dtype

        keys = jax.random.split(key, 8)
        bound = 1.0 / math.sqrt(d_model)

        def init_w(k):          # torch Linear weight is [out,in]; store transposed.
            return jax.random.uniform(k, (d_model, d_model), jnp.float32,
                                      -bound, bound)

        def init_b(k):
            return jax.random.uniform(k, (d_model,), jnp.float32, -bound, bound)

        # Raw f32 params (used by the pure-JAX reference).
        self.wq, self.bq = init_w(keys[0]), init_b(keys[1])
        self.wk, self.bk = init_w(keys[2]), init_b(keys[3])
        self.wv, self.bv = init_w(keys[4]), init_b(keys[5])
        self.wo, self.bo = init_w(keys[6]), init_b(keys[7])

        # Fold 1/sqrt(head_dim) into the Q projection params (done once, host-side).
        inv_scale = 1.0 / self.scale
        wq_s, bq_s = self.wq * inv_scale, self.bq * inv_scale

        cd = compute_dtype
        # Fused QKV projection for the self-attention case (single [D, 3D] GEMM);
        # separate projections for the general cross-attention case.  All weights
        # are cast + padded exactly once here.
        self.proj_qkv = _PallasLinear(
            jnp.concatenate([wq_s, self.wk, self.wv], axis=1),
            jnp.concatenate([bq_s, self.bk, self.bv]), cd)
        self.proj_q = _PallasLinear(wq_s, bq_s, cd)
        self.proj_k = _PallasLinear(self.wk, self.bk, cd)
        self.proj_v = _PallasLinear(self.wv, self.bv, cd)
        self.proj_o = _PallasLinear(self.wo, self.bo, cd)

    def __call__(self, query, key, value, attn_mask=None, need_weights=True):
        B, Lq, D = query.shape
        Lk = key.shape[1]
        assert D == self.d_model
        H, hd = self.n_heads, self.head_dim

        # ---- projections (no head-split transposes: [B*L, D] slabs throughout) --
        if query is key and key is value:
            qkv = self.proj_qkv(query.reshape(B * Lq, D))        # [B*Lq, 3D]
            qkv = qkv.reshape(B, Lq, 3, H, hd)                   # free reshape
            q_arr = k_arr = v_arr = qkv
            sels = (0, 1, 2)
        else:
            q_arr = self.proj_q(query.reshape(B * Lq, D)).reshape(B, Lq, 1, H, hd)
            k_arr = self.proj_k(key.reshape(B * Lk, D)).reshape(B, Lk, 1, H, hd)
            v_arr = self.proj_v(value.reshape(B * Lk, D)).reshape(B, Lk, 1, H, hd)
            sels = (0, 0, 0)

        # ---- mask: natural [1-or-B, Lq, Lk] shape, broadcast across heads -------
        mask = None
        if attn_mask is not None:
            m = jnp.asarray(attn_mask)
            if m.ndim == 2:
                m = m.reshape(1, Lq, Lk)
            elif m.ndim == 4:
                # TODO(synk): per-head masks ([B, H, Lq, Lk]) are not supported.
                assert m.shape[1] == 1, "per-head attn_mask not supported"
                m = m.reshape(m.shape[0], Lq, Lk)
            assert m.shape == (1, Lq, Lk) or m.shape == (B, Lq, Lk)
            mask = (m != 0).astype(jnp.float32)

        attn_out, attn_w = _attention(q_arr, k_arr, v_arr, sels, n_heads=H,
                                      mask=mask, need_weights=need_weights)

        # [B, Lq, H, hd] == [B*Lq, D] slab -> output projection (no transpose).
        out = self.proj_o(attn_out.reshape(B * Lq, D),
                          out_dtype=jnp.float32).reshape(B, Lq, D)
        return out, attn_w


# ----------------------------------------------------------------------------
# Pure-JAX reference (HIGHEST precision) for validation
# ----------------------------------------------------------------------------
def reference_forward(mod, query, key, value, attn_mask=None):
    P = jax.lax.Precision.HIGHEST
    B, Lq, D = query.shape
    Lk = key.shape[1]
    H, hd = mod.n_heads, mod.head_dim
    Q = jnp.dot(query.reshape(-1, D), mod.wq, precision=P) + mod.bq
    K = jnp.dot(key.reshape(-1, D), mod.wk, precision=P) + mod.bk
    V = jnp.dot(value.reshape(-1, D), mod.wv, precision=P) + mod.bv
    Q = Q.reshape(B, Lq, H, hd).transpose(0, 2, 1, 3)
    K = K.reshape(B, Lk, H, hd).transpose(0, 2, 1, 3)
    V = V.reshape(B, Lk, H, hd).transpose(0, 2, 1, 3)
    s = jnp.einsum("bhqd,bhkd->bhqk", Q, K, precision=P) / mod.scale
    if attn_mask is not None:
        m = jnp.asarray(attn_mask)
        m = jnp.broadcast_to(m, (B, H, Lq, Lk)) if m.ndim != 4 else m
        s = jnp.where(m == 0, -1e9, s)
    w = jax.nn.softmax(s, axis=-1)
    o = jnp.einsum("bhqk,bhkd->bhqd", w, V, precision=P)
    o = o.transpose(0, 2, 1, 3).reshape(B * Lq, D)
    out = (jnp.dot(o, mod.wo, precision=P) + mod.bo).reshape(B, Lq, D)
    return out, w


if __name__ == "__main__":
    B, L, D, H = 2, 8, 32, 4

    root = jax.random.PRNGKey(0)
    k_param, k_q, k_k, k_v = jax.random.split(root, 4)

    query = jax.random.normal(k_q, (B, L, D), jnp.float32)
    key = jax.random.normal(k_k, (B, L, D), jnp.float32)
    value = jax.random.normal(k_v, (B, L, D), jnp.float32)

    # ---- f32 compute: tight numerics validation --------------------------------
    mod32 = CustomMultiHeadAttentionPallas(D, H, key=k_param,
                                           compute_dtype=jnp.float32)

    # 1) cross-attention (separate projections), returns weights
    out, attn_w = mod32(query, key, value)
    out = jax.block_until_ready(out)
    attn_w = jax.block_until_ready(attn_w)
    ref_out, ref_w = reference_forward(mod32, query, key, value)
    assert out.shape == (B, L, D) and attn_w.shape == (B, H, L, L)
    assert jnp.allclose(out, ref_out, atol=1e-3, rtol=1e-3)
    assert jnp.allclose(attn_w, ref_w, atol=1e-4, rtol=1e-3)

    # 2) self-attention (fused [D,3D] QKV projection) + causal mask
    causal = jnp.tril(jnp.ones((L, L), jnp.int32))
    out_s, w_s = mod32(query, query, query, attn_mask=causal)
    out_s = jax.block_until_ready(out_s)
    ref_out_s, ref_w_s = reference_forward(mod32, query, query, query,
                                           attn_mask=causal)
    assert jnp.allclose(out_s, ref_out_s, atol=1e-3, rtol=1e-3)
    assert jnp.allclose(w_s, ref_w_s, atol=1e-4, rtol=1e-3)

    # 3) flash (no-weights) path, with and without mask
    out_f, w_none = mod32(query, key, value, need_weights=False)
    out_f = jax.block_until_ready(out_f)
    assert w_none is None
    assert jnp.allclose(out_f, ref_out, atol=1e-3, rtol=1e-3)

    out_fm, _ = mod32(query, query, query, attn_mask=causal, need_weights=False)
    out_fm = jax.block_until_ready(out_fm)
    assert jnp.allclose(out_fm, ref_out_s, atol=1e-3, rtol=1e-3)

    # ---- default bf16 compute path (perf config): looser tolerance -------------
    mod_bf16 = CustomMultiHeadAttentionPallas(D, H, key=k_param)  # bf16 default
    out_b, w_b = mod_bf16(query, query, query)
    out_b = jax.block_until_ready(out_b)
    ref_out_b, ref_w_b = reference_forward(mod_bf16, query, query, query)
    assert jnp.allclose(out_b, ref_out_b, atol=7e-2, rtol=7e-2)
    assert jnp.allclose(w_b, ref_w_b, atol=4e-2, rtol=4e-2)

    print("KERNEL_OK")
</pallas_src>

<mosaic_0001>
module attributes {stable_mosaic.version = 11 : i64} {
  func.func @_linear_kernel(%arg0: i32, %arg1: i32, %arg2: i32, %arg3: memref<16x256xf32, #tpu.memory_space<vmem>>, %arg4: memref<256x256xf32, #tpu.memory_space<vmem>>, %arg5: memref<1x256xf32, #tpu.memory_space<vmem>>, %arg6: memref<16x256xf32, #tpu.memory_space<vmem>>, %arg7: memref<16x256xf32, #tpu.memory_space<vmem>>) attributes {dimension_semantics = [#tpu.dimension_semantics<parallel>, #tpu.dimension_semantics<parallel>, #tpu.dimension_semantics<arbitrary>], iteration_bounds = array<i64: 1, 1, 1>, scalar_prefetch = 0 : i64, scratch_operands = 1 : i64, tpu.core_type = #tpu.core_type<tc>, window_params = [{transform_indices = @transform_0, window_bounds = array<i64: 16, 256>}, {transform_indices = @transform_1, window_bounds = array<i64: 256, 256>}, {transform_indices = @transform_2, window_bounds = array<i64: 1, 256>}, {transform_indices = @transform_3, window_bounds = array<i64: 16, 256>}]} {
    %c0_i32 = arith.constant 0 : i32
    %0 = arith.cmpi eq, %arg2, %c0_i32 : i32
    %1 = arith.extui %0 : i1 to i32
    %c0_i32_0 = arith.constant 0 : i32
    %2 = arith.cmpi ne, %1, %c0_i32_0 : i32
    scf.if %2 {
      %cst_10 = arith.constant 0.000000e+00 : f32
      %12 = vector.broadcast %cst_10 : f32 to vector<16x256xf32>
      %c0_11 = arith.constant 0 : index
      %c0_12 = arith.constant 0 : index
      %13 = vector.load %arg7[%c0_11, %c0_12] : memref<16x256xf32, #tpu.memory_space<vmem>>, vector<16x256xf32>
      tpu.vector_store %arg7[%c0_11, %c0_12], %12 {strides = array<i32>} : memref<16x256xf32, #tpu.memory_space<vmem>>, vector<16x256xf32>,
    } else {
    }
    %c0 = arith.constant 0 : index
    %c0_1 = arith.constant 0 : index
    %3 = vector.load %arg7[%c0, %c0_1] : memref<16x256xf32, #tpu.memory_space<vmem>>, vector<16x256xf32>
    %c0_2 = arith.constant 0 : index
    %c0_3 = arith.constant 0 : index
    %4 = vector.load %arg3[%c0_2, %c0_3] : memref<16x256xf32, #tpu.memory_space<vmem>>, vector<16x256xf32>
    %c0_4 = arith.constant 0 : index
    %c0_5 = arith.constant 0 : index
    %5 = vector.load %arg4[%c0_4, %c0_5] : memref<256x256xf32, #tpu.memory_space<vmem>>, vector<256x256xf32>
    %cst = arith.constant dense<0.000000e+00> : vector<16x256xf32>
    %6 = tpu.matmul %4, %5, %cst {dimension_numbers = #tpu.dot_dimension_numbers<[1], [0], [0], [1], [0, 0, 1, 1], [], []>} : vector<16x256xf32>, vector<256x256xf32>, vector<16x256xf32> -> vector<16x256xf32>
    %7 = arith.addf %3, %6 : vector<16x256xf32>
    %c0_6 = arith.constant 0 : index
    %c0_7 = arith.constant 0 : index
    %8 = vector.load %arg7[%c0_6, %c0_7] : memref<16x256xf32, #tpu.memory_space<vmem>>, vector<16x256xf32>
    tpu.vector_store %arg7[%c0_6, %c0_7], %7 {strides = array<i32>} : memref<16x256xf32, #tpu.memory_space<vmem>>, vector<16x256xf32>,
    %c0_i32_8 = arith.constant 0 : i32
    %9 = arith.cmpi eq, %arg2, %c0_i32_8 : i32
    %10 = arith.extui %9 : i1 to i32
    %c0_i32_9 = arith.constant 0 : i32
    %11 = arith.cmpi ne, %10, %c0_i32_9 : i32
    scf.if %11 {
      %c0_10 = arith.constant 0 : index
      %c0_11 = arith.constant 0 : index
      %12 = vector.load %arg7[%c0_10, %c0_11] : memref<16x256xf32, #tpu.memory_space<vmem>>, vector<16x256xf32>
      %c0_12 = arith.constant 0 : index
      %c0_13 = arith.constant 0 : index
      %13 = vector.load %arg5[%c0_12, %c0_13] : memref<1x256xf32, #tpu.memory_space<vmem>>, vector<1x256xf32>
      %14 = vector.broadcast %13 : vector<1x256xf32> to vector<16x256xf32>
      %15 = arith.addf %12, %14 : vector<16x256xf32>
      %c0_14 = arith.constant 0 : index
      %c0_15 = arith.constant 0 : index
      %16 = vector.load %arg6[%c0_14, %c0_15] : memref<16x256xf32, #tpu.memory_space<vmem>>, vector<16x256xf32>
      tpu.vector_store %arg6[%c0_14, %c0_15], %15 {strides = array<i32>} : memref<16x256xf32, #tpu.memory_space<vmem>>, vector<16x256xf32>,
    } else {
    }
    return
  }
  func.func @transform_0(%arg0: i32, %arg1: i32, %arg2: i32) -> (i32, i32) {
    %c0_i32 = arith.constant 0 : i32
    return %arg0, %arg2 : i32, i32
  }
  func.func @transform_1(%arg0: i32, %arg1: i32, %arg2: i32) -> (i32, i32) {
    %c0_i32 = arith.constant 0 : i32
    return %arg2, %arg1 : i32, i32
  }
  func.func @transform_2(%arg0: i32, %arg1: i32, %arg2: i32) -> (i32, i32) {
    %c0_i32 = arith.constant 0 : i32
    %c0_i32_0 = arith.constant 0 : i32
    return %c0_i32, %arg1 : i32, i32
  }
  func.func @transform_3(%arg0: i32, %arg1: i32, %arg2: i32) -> (i32, i32) {
    %c0_i32 = arith.constant 0 : i32
    return %arg0, %arg1 : i32, i32
  }
}

</mosaic_0001>

<bundles_post_ra>
// kernel: tpu_custom_call.1
= control target key start
LH: loop header
LB: loop body
LE: loop exit
PB: predicated region body
PF: predicated region fallthrough
CT: control target
= control target key end

     0   :  { %8 = vsyncpa [#allocation4], 0  ;;  %s499_s0 = inlined_call_operand.hbm [shape: f32[16,256], index: 0, kind: input, shape index: {}]   ;;  %s500_s1 = inlined_call_operand.hbm [shape: f32[256,256], index: 1, kind: input, shape index: {}]   ;;  %s501_s2 = inlined_call_operand.vmem [shape: f32[1,256], index: 2, kind: input, shape index: {}]   ;;  %s502_s3 = inlined_call_operand.hbm [shape: f32[16,256], index: 3, kind: output, shape index: {}]  }
   0x1   :  { %9 = vsyncpa [#allocation7], 0 }
   0x2   :  { %10 = vsyncpa [#allocation5], 0  ;;  %s426_s12 = smov [#allocation3]   ;;  %s354_s16 = scalar_lea.hbm %s499_s0, 512 }
   0x3   :  { %s16_s13 = sshll.u32 %s426_s12, 4  ;;  %p355_p0 = scmp.ne.s32.totalorder %s499_s0, %s354_s16  ;;  %s17_s13 = int_to_ptr.vmem [resolvable:$true] %s16_s13 }
   0x4   :  { %p358_p1 = scmp.lt.u32.totalorder %s354_s16, %s499_s0 }
   0x6   :  { %p360_p2 = pnand %p358_p1, %p355_p0 }
   0x8   :  { %363 = shalt.err (!%p360_p2)
}
   0x9   :  { %s364_s21 = scalar_lea.vmem %s17_s13, 512  ;;  %p369_p4 = scmp.lt.s32.totalorder %s17_s13, %s17_s13 }
   0xa   :  { %p365_p3 = scmp.ne.s32.totalorder %s17_s13, %s364_s21  ;;  %p370_p5 = scmp.lt.s32.totalorder %s364_s21, %s364_s21 }
   0xc   :  { %p371_p6 = por %p370_p5, %p369_p4 }
   0xe   :  { %p372_p7 = pnand %p371_p6, %p365_p3 }
  0x10   :  { %375 = shalt.err (!%p372_p7)
}
  0x11   :  { %s427_s22 = smov 256   ;;  %s428_s23 = smov 16  }
  0x12   :  { %22 = dma.hbm_to_vmem [thread:$0]  %s499_s0, 512, %s17_s13, [#allocation4], %s427_s22, %s427_s22, %s428_s23  }
  0x13   :  { %s429_s26 = smov [#allocation6]   ;;  %s376_s30 = scalar_lea.hbm %s500_s1, 8192 }
  0x14   :  { %s28_s27 = sshll.u32 %s429_s26, 4  ;;  %p377_p8 = scmp.ne.s32.totalorder %s500_s1, %s376_s30  ;;  %s29_s27 = int_to_ptr.vmem [resolvable:$true] %s28_s27 }
  0x15   :  { %p380_p9 = scmp.lt.u32.totalorder %s376_s30, %s500_s1 }
  0x17   :  { %p382_p10 = pnand %p380_p9, %p377_p8 }
  0x19   :  { %385 = shalt.err (!%p382_p10)
}
  0x1a   :  { %s386_s8 = scalar_lea.vmem %s29_s27, 8192  ;;  %p391_p12 = scmp.lt.s32.totalorder %s29_s27, %s29_s27 }
  0x1b   :  { %p387_p11 = scmp.ne.s32.totalorder %s29_s27, %s386_s8  ;;  %p392_p13 = scmp.lt.s32.totalorder %s386_s8, %s386_s8 }
  0x1d   :  { %p393_p0 = por %p392_p13, %p391_p12 }
  0x1f   :  { %p394_p1 = pnand %p393_p0, %p387_p11 }
  0x21   :  { %397 = shalt.err (!%p394_p1)
}
  0x22   :  { %34 = dma.hbm_to_vmem [thread:$0]  %s500_s1, 8192, %s29_s27, [#allocation7], %s427_s22, %s427_s22, %s428_s23  }
  0x23   :  { %420 = dma.done.wait [#allocation4], 512  }
  0x24   :  { %421 = vsyncadd [#allocation4], 4294966784 }
  0x25   :  { %422 = dma.done.wait [#allocation7], 8192  }
  0x26   :  { %423 = vsyncadd [#allocation7], 4294959104  ;;  %v60_v0 = vld [vmem:[#allocation6 + $0x8] sm:$0xff]  ;;  %v62_v1 = vld [vmem:[#allocation6 + $0x18] sm:$0xff]  ;;  %s430_s11 = smov [#allocation8]  }
  0x27   :  { %v59_v2 = vld [vmem:[#allocation6] sm:$0xff]  ;;  %v253_v3 = vpack.c.bf16 %v62_v1, %v60_v0  ;;  %v61_v4 = vld [vmem:[#allocation6 + $0x10] sm:$0xff]  ;;  %v64_v5 = vld [vmem:[#allocation6 + $0x28] sm:$0xff]  ;;  %s240_s12 = sshll.u32 %s430_s11, 4  ;;  %s241_s12 = int_to_ptr.vmem [resolvable:$true] %s240_s12 }
  0x28   :  { %v66_v6 = vld [vmem:[#allocation6 + $0x38] sm:$0xff]  ;;  %v255_v7 = vpack.c.bf16 %v61_v4, %v59_v2  ;;  %v63_v9 = vld [vmem:[#allocation6 + $0x20] sm:$0xff]  ;;  %v65_v10 = vld [vmem:[#allocation6 + $0x30] sm:$0xff]  ;;  %s398_s13 = scalar_lea.vmem %s241_s12, 512  ;;  %p403_p3 = scmp.lt.s32.totalorder %s241_s12, %s241_s12 }
  0x29   :  { %v257_v8 = vpack.c.bf16 %v66_v6, %v64_v5  ;;  %v68_v11 = vld [vmem:[#allocation6 + $0x48] sm:$0xff]  ;;  %254 = vmatprep.subr.bf16.mxu0 %v253_v3  ;;  %317 = vmatprep.subr.bf16.mxu1 %v253_v3  ;;  %v70_v12 = vld [vmem:[#allocation6 + $0x58] sm:$0xff]  ;;  %v259_v13 = vpack.c.bf16 %v65_v10, %v63_v9  ;;  %v67_v15 = vld [vmem:[#allocation6 + $0x40] sm:$0xff]  ;;  %p399_p2 = scmp.ne.s32.totalorder %s241_s12, %s398_s13  ;;  %p404_p4 = scmp.lt.s32.totalorder %s398_s13, %s398_s13 }
  0x2a   :  { %256 = vmatpush1.bf16.msra.mxu0 %v255_v7  ;;  %333 = vmatpush1.bf16.msra.mxu1 %v255_v7  ;;  %v261_v14 = vpack.c.bf16 %v70_v12, %v68_v11  ;;  %v69_v16 = vld [vmem:[#allocation6 + $0x50] sm:$0xff]  ;;  %v72_v17 = vld [vmem:[#allocation6 + $0x68] sm:$0xff]  ;;  %v74_v18 = vld [vmem:[#allocation6 + $0x78] sm:$0xff] }
  0x2b   :  { %258 = vmatprep.subr.bf16.mxu0 %v257_v8  ;;  %318 = vmatprep.subr.bf16.mxu1 %v257_v8  ;;  %v263_v19 = vpack.c.bf16 %v69_v16, %v67_v15  ;;  %v265_v20 = vpack.c.bf16 %v74_v18, %v72_v17  ;;  %v71_v21 = vld [vmem:[#allocation6 + $0x60] sm:$0xff]  ;;  %v73_v22 = vld [vmem:[#allocation6 + $0x70] sm:$0xff]  ;;  %v76_v23 = vld [vmem:[#allocation6 + $0x88] sm:$0xff]  ;;  %p405_p5 = por %p404_p4, %p403_p3 }
  0x2c   :  { %v78_v24 = vld [vmem:[#allocation6 + $0x98] sm:$0xff]  ;;  %v267_v25 = vpack.c.bf16 %v73_v22, %v71_v21  ;;  %v75_v27 = vld [vmem:[#allocation6 + $0x80] sm:$0xff]  ;;  %v77_v28 = vld [vmem:[#allocation6 + $0x90] sm:$0xff] }
  0x2d   :  { %v269_v26 = vpack.c.bf16 %v78_v24, %v76_v23  ;;  %v80_v29 = vld [vmem:[#allocation6 + $0xa8] sm:$0xff]  ;;  %v82_v30 = vld [vmem:[#allocation6 + $0xb8] sm:$0xff]  ;;  %v271_v31 = vpack.c.bf16 %v77_v28, %v75_v27  ;;  %v79_v33 = vld [vmem:[#allocation6 + $0xa0] sm:$0xff]  ;;  %p406_p6 = pnand %p405_p5, %p399_p2 }
  0x2e   :  { %260 = vmatpush1.bf16.msra.mxu0 %v259_v13  ;;  %334 = vmatpush1.bf16.msra.mxu1 %v259_v13  ;;  %v273_v32 = vpack.c.bf16 %v82_v30, %v80_v29  ;;  %v81_v34 = vld [vmem:[#allocation6 + $0xb0] sm:$0xff]  ;;  %v84_v35 = vld [vmem:[#allocation6 + $0xc8] sm:$0xff]  ;;  %v86_v36 = vld [vmem:[#allocation6 + $0xd8] sm:$0xff] }
  0x2f   :  { %262 = vmatprep.subr.bf16.mxu0 %v261_v14  ;;  %319 = vmatprep.subr.bf16.mxu1 %v261_v14  ;;  %v275_v37 = vpack.c.bf16 %v81_v34, %v79_v33  ;;  %v83_v38 = vld [vmem:[#allocation6 + $0xc0] sm:$0xff]  ;;  %v277_v39 = vpack.c.bf16 %v86_v36, %v84_v35  ;;  %v85_v40 = vld [vmem:[#allocation6 + $0xd0] sm:$0xff]  ;;  %v56_v41 = vld [vmem:[#allocation3 + $0x8] sm:$0xff]  ;;  %v217_v36 = vlaneseq }
  0x30   :  { %v58_v42 = vld [vmem:[#allocation3 + $0x18] sm:$0xff]  ;;  %v88_v43 = vld [vmem:[#allocation6 + $0xe8] sm:$0xff]  ;;  %187 = vmatprep.mubr.f32.mxu0 %v56_v41  ;;  %v279_v45 = vpack.c.bf16 %v85_v40, %v83_v38  ;;  %v87_v47 = vld [vmem:[#allocation6 + $0xe0] sm:$0xff] }
  0x31   :  { %v90_v44 = vld [vmem:[#allocation6 + $0xf8] sm:$0xff]  ;;  %193 = vmatprep.mubr.f32.mxu1 %v58_v42  ;;  %v89_v48 = vld [vmem:[#allocation6 + $0xf0] sm:$0xff]  ;;  %v92_v49 = vld [vmem:[#allocation6 + $0x108] sm:$0xff] }
  0x32   :  { %264 = vmatpush1.bf16.msra.mxu0 %v263_v19  ;;  %335 = vmatpush1.bf16.msra.mxu1 %v263_v19  ;;  %v281_v46 = vpack.c.bf16 %v90_v44, %v88_v43  ;;  %v94_v50 = vld [vmem:[#allocation6 + $0x118] sm:$0xff]  ;;  %v283_v51 = vpack.c.bf16 %v89_v48, %v87_v47  ;;  %v91_v53 = vld [vmem:[#allocation6 + $0x100] sm:$0xff]  ;;  %v93_v54 = vld [vmem:[#allocation6 + $0x110] sm:$0xff] }
  0x33   :  { %266 = vmatprep.subr.bf16.mxu0 %v265_v20  ;;  %320 = vmatprep.subr.bf16.mxu1 %v265_v20  ;;  %v285_v52 = vpack.c.bf16 %v94_v50, %v92_v49  ;;  %v96_v55 = vld [vmem:[#allocation6 + $0x128] sm:$0xff]  ;;  %v98_v56 = vld [vmem:[#allocation6 + $0x138] sm:$0xff]  ;;  %v287_v57 = vpack.c.bf16 %v93_v54, %v91_v53  ;;  %v95_v59 = vld [vmem:[#allocation6 + $0x120] sm:$0xff] }
  0x34   :  { %v289_v58 = vpack.c.bf16 %v98_v56, %v96_v55  ;;  %v97_v60 = vld [vmem:[#allocation6 + $0x130] sm:$0xff]  ;;  %v100_v61 = vld [vmem:[#allocation6 + $0x148] sm:$0xff]  ;;  %v102_v62 = vld [vmem:[#allocation6 + $0x158] sm:$0xff] }
  0x35   :  { %v291_v63 = vpack.c.bf16 %v97_v60, %v95_v59  ;;  %v293_v0 = vpack.c.bf16 %v102_v62, %v100_v61  ;;  %v99_v1 = vld [vmem:[#allocation6 + $0x140] sm:$0xff]  ;;  %v101_v2 = vld [vmem:[#allocation6 + $0x150] sm:$0xff]  ;;  %v104_v3 = vld [vmem:[#allocation6 + $0x168] sm:$0xff] }
  0x36   :  { %268 = vmatpush1.bf16.msra.mxu0 %v267_v25  ;;  %336 = vmatpush1.bf16.msra.mxu1 %v267_v25  ;;  %v106_v4 = vld [vmem:[#allocation6 + $0x178] sm:$0xff]  ;;  %v295_v5 = vpack.c.bf16 %v101_v2, %v99_v1  ;;  %v103_v7 = vld [vmem:[#allocation6 + $0x160] sm:$0xff]  ;;  %v105_v8 = vld [vmem:[#allocation6 + $0x170] sm:$0xff] }
  0x37   :  { %270 = vmatprep.subr.bf16.mxu0 %v269_v26  ;;  %321 = vmatprep.subr.bf16.mxu1 %v269_v26  ;;  %v297_v6 = vpack.c.bf16 %v106_v4, %v104_v3  ;;  %v108_v9 = vld [vmem:[#allocation6 + $0x188] sm:$0xff]  ;;  %v110_v10 = vld [vmem:[#allocation6 + $0x198] sm:$0xff]  ;;  %v299_v11 = vpack.c.bf16 %v105_v8, %v103_v7  ;;  %v107_v13 = vld [vmem:[#allocation6 + $0x180] sm:$0xff] }
  0x38   :  { %v301_v12 = vpack.c.bf16 %v110_v10, %v108_v9  ;;  %v109_v14 = vld [vmem:[#allocation6 + $0x190] sm:$0xff]  ;;  %v112_v15 = vld [vmem:[#allocation6 + $0x1a8] sm:$0xff]  ;;  %v114_v16 = vld [vmem:[#allocation6 + $0x1b8] sm:$0xff] }
  0x39   :  { %v303_v17 = vpack.c.bf16 %v109_v14, %v107_v13  ;;  %v305_v18 = vpack.c.bf16 %v114_v16, %v112_v15  ;;  %v111_v19 = vld [vmem:[#allocation6 + $0x1a0] sm:$0xff]  ;;  %v113_v20 = vld [vmem:[#allocation6 + $0x1b0] sm:$0xff]  ;;  %v116_v21 = vld [vmem:[#allocation6 + $0x1c8] sm:$0xff] }
  0x3a   :  { %272 = vmatpush1.bf16.msra.mxu0 %v271_v31  ;;  %337 = vmatpush1.bf16.msra.mxu1 %v271_v31  ;;  %v118_v22 = vld [vmem:[#allocation6 + $0x1d8] sm:$0xff]  ;;  %v307_v23 = vpack.c.bf16 %v113_v20, %v111_v19  ;;  %v115_v25 = vld [vmem:[#allocation6 + $0x1c0] sm:$0xff]  ;;  %v117_v26 = vld [vmem:[#allocation6 + $0x1d0] sm:$0xff] }
  0x3b   :  { %274 = vmatprep.subr.bf16.mxu0 %v273_v32  ;;  %322 = vmatprep.subr.bf16.mxu1 %v273_v32  ;;  %v309_v24 = vpack.c.bf16 %v118_v22, %v116_v21  ;;  %v120_v27 = vld [vmem:[#allocation6 + $0x1e8] sm:$0xff]  ;;  %v122_v28 = vld [vmem:[#allocation6 + $0x1f8] sm:$0xff]  ;;  %v311_v29 = vpack.c.bf16 %v117_v26, %v115_v25  ;;  %v119_v31 = vld [vmem:[#allocation6 + $0x1e0] sm:$0xff] }
  0x3c   :  { %v313_v30 = vpack.c.bf16 %v122_v28, %v120_v27  ;;  %v121_v32 = vld [vmem:[#allocation6 + $0x1f0] sm:$0xff]  ;;  %v55_v34 = vld [vmem:[#allocation3] sm:$0xff] }
  0x3d   :  { %v315_v33 = vpack.c.bf16 %v121_v32, %v119_v31  ;;  %v57_v35 = vld [vmem:[#allocation3 + $0x10] sm:$0xff] }
  0x3e   :  { %276 = vmatpush1.bf16.msra.mxu0 %v275_v37  ;;  %338 = vmatpush1.bf16.msra.mxu1 %v275_v37  ;;  %v218_v37 = vshrl.u32 %v217_v36, 7 }
  0x3f   :  { %278 = vmatprep.subr.bf16.mxu0 %v277_v39  ;;  %323 = vmatprep.subr.bf16.mxu1 %v277_v39  ;;  %v215_v39 = vld [vmem:[%s501_s2] sm:$0x3] }
  0x40   :  { %v219_v38 = vsub.s32 0, %v218_v37  ;;  %v223_v40 = vsub.s32 1, %v218_v37 }
  0x42   :  { %280 = vmatpush1.bf16.msra.mxu0 %v279_v45  ;;  %339 = vmatpush1.bf16.msra.mxu1 %v279_v45  ;;  %v220_v41 = vrot.slane %v215_v39, %v219_v38  ;;  %v224_v42 = vrot.slane %v215_v39, %v223_v40 }
  0x43   :  { %282 = vmatprep.subr.bf16.mxu0 %v281_v46  ;;  %324 = vmatprep.subr.bf16.mxu1 %v281_v46 }
  0x46   :  { %284 = vmatpush1.bf16.msra.mxu0 %v283_v51  ;;  %340 = vmatpush1.bf16.msra.mxu1 %v283_v51 }
  0x47   :  { %286 = vmatprep.subr.bf16.mxu0 %v285_v52  ;;  %325 = vmatprep.subr.bf16.mxu1 %v285_v52 }
  0x4a   :  { %288 = vmatpush1.bf16.msra.mxu0 %v287_v57  ;;  %341 = vmatpush1.bf16.msra.mxu1 %v287_v57 }
  0x4b   :  { %290 = vmatprep.subr.bf16.mxu0 %v289_v58  ;;  %326 = vmatprep.subr.bf16.mxu1 %v289_v58 }
  0x4e   :  { %292 = vmatpush1.bf16.msra.mxu0 %v291_v63  ;;  %342 = vmatpush1.bf16.msra.mxu1 %v291_v63 }
  0x4f   :  { %294 = vmatprep.subr.bf16.mxu0 %v293_v0  ;;  %327 = vmatprep.subr.bf16.mxu1 %v293_v0 }
  0x52   :  { %296 = vmatpush1.bf16.msra.mxu0 %v295_v5  ;;  %343 = vmatpush1.bf16.msra.mxu1 %v295_v5 }
  0x53   :  { %298 = vmatprep.subr.bf16.mxu0 %v297_v6  ;;  %328 = vmatprep.subr.bf16.mxu1 %v297_v6 }
  0x56   :  { %300 = vmatpush1.bf16.msra.mxu0 %v299_v11  ;;  %344 = vmatpush1.bf16.msra.mxu1 %v299_v11 }
  0x57   :  { %302 = vmatprep.subr.bf16.mxu0 %v301_v12  ;;  %329 = vmatprep.subr.bf16.mxu1 %v301_v12 }
  0x5a   :  { %304 = vmatpush1.bf16.msra.mxu0 %v303_v17  ;;  %345 = vmatpush1.bf16.msra.mxu1 %v303_v17 }
  0x5b   :  { %306 = vmatprep.subr.bf16.mxu0 %v305_v18  ;;  %330 = vmatprep.subr.bf16.mxu1 %v305_v18 }
  0x5e   :  { %308 = vmatpush1.bf16.msra.mxu0 %v307_v23  ;;  %346 = vmatpush1.bf16.msra.mxu1 %v307_v23 }
  0x5f   :  { %310 = vmatprep.subr.bf16.mxu0 %v309_v24  ;;  %331 = vmatprep.subr.bf16.mxu1 %v309_v24 }
  0x62   :  { %312 = vmatpush1.bf16.msra.mxu0 %v311_v29  ;;  %347 = vmatpush1.bf16.msra.mxu1 %v311_v29 }
  0x63   :  { %314 = vmatprep.subr.bf16.mxu0 %v313_v30  ;;  %332 = vmatprep.subr.bf16.mxu1 %v313_v30 }
  0x66   :  { %316 = vmatpush1.bf16.msra.mxu0 %v315_v33  ;;  %348 = vmatpush1.bf16.msra.mxu1 %v315_v33 }
  0x69   :  { %188 = vmatmul.mubr.f32.vlgmr.msra.gmra.mrb[0].mxu0 %v55_v34  ;;  %194 = vmatmul.mubr.f32.vlgmr.msra.gmra.mrb[0].mxu1 %v57_v35 }
 0x13c   :  { %v189_v43 = vpop.f32.mrb[0].mxu0  ;;  %v195_v44 = vpop.f32.mrb[0].mxu1 }
 0x13d   :  { %v227_v45 = vadd.f32 %v220_v41, %v189_v43  ;;  %v229_v46 = vadd.f32 %v220_v41, %v195_v44  ;;  %v191_v47 = vpop.f32.mrb[1].mxu0  ;;  %v197_v48 = vpop.f32.mrb[1].mxu1 }
 0x13e   :  { %v228_v49 = vadd.f32 %v224_v42, %v191_v47  ;;  %v230_v50 = vadd.f32 %v224_v42, %v197_v48 }
 0x13f   :  { %231 = vst [vmem:[#allocation8] sm:$0xff] %v227_v45  ;;  %233 = vst [vmem:[#allocation8 + $0x10] sm:$0xff] %v229_v46 }
 0x140   :  { %232 = vst [vmem:[#allocation8 + $0x8] sm:$0xff] %v228_v49  ;;  %234 = vst [vmem:[#allocation8 + $0x18] sm:$0xff] %v230_v50 }
 0x141   :  { %409 = shalt.err (!%p406_p6)
}
 0x142   :  { %s410_s15 = scalar_lea.hbm %s502_s3, 512 }
 0x143   :  { %p411_p7 = scmp.ne.s32.totalorder %s502_s3, %s410_s15  ;;  %p414_p8 = scmp.lt.u32.totalorder %s410_s15, %s502_s3 }
 0x145   :  { %p416_p9 = pnand %p414_p8, %p411_p7 }
 0x147   :  { %419 = shalt.err (!%p416_p9)
}
 0x148   :  { %246 = dma.vmem_to_hbm [thread:$0]  %s241_s12, 512, %s502_s3, [#allocation5], %s427_s22, %s427_s22, %s428_s23  }
 0x149   :  { %424 = dma.done.wait [#allocation5], 512  }
 0x14a   :  { %425 = vsyncadd [#allocation5], 4294966784 }
 0x14b   :  { %250 = vsyncpa [#allocation4], 1 }
 0x14c   :  { %251 = vsyncpa [#allocation7], 1 }
 0x14d   :  { %252 = vsyncpa [#allocation5], 1 }

</bundles_post_ra>
